<compile_context>
chip_gen: v5e
topology: v5e:2x2
jax: 0.10.0
libtpu: 0.0.40
codegen_flags: <defaults>
</compile_context>

<pallas_src>
import functools

import jax
import jax.numpy as jnp
from jax.experimental import pallas as pl
from jax.experimental.pallas import tpu as pltpu


_LANE = 128      # TPU lane width (last dim)
_SUBLANE = 8     # TPU sublane width (second-to-last dim)
_MAX_TILE = 512  # cap per-block tile size: keeps double-buffered blocks well
                 # inside v7x's 32 MiB scoped VMEM (and is near the measured
                 # roofline sweet spot on v6e)


def _round_up(x, m):
    return ((x + m - 1) // m) * m


def _lane_pad(n):
    """Pad a lane dimension to a multiple of 128 and of its own tile size."""
    p = _round_up(n, _LANE)
    t = min(p, _MAX_TILE)
    return _round_up(p, t)


# ----------------------------------------------------------------------------
# Pallas kernel: tiled fused linear  o = x @ W + b   (bf16 in, f32 accumulate)
# ----------------------------------------------------------------------------
def _linear_kernel(x_ref, w_ref, b_ref, o_ref, acc_ref):
    k = pl.program_id(2)

    @pl.when(k == 0)
    def _():
        acc_ref[...] = jnp.zeros_like(acc_ref)

    acc_ref[...] += jnp.dot(
        x_ref[...], w_ref[...], preferred_element_type=jnp.float32
    )

    @pl.when(k == pl.num_programs(2) - 1)
    def _():
        # Bias add / epilogue in f32 on the VPU, single lane-dense store.
        o_ref[...] = (acc_ref[...] + b_ref[...]).astype(o_ref.dtype)


def _pallas_linear_padded(x_p, w_p, b_p, *, tm, tk, tn):
    """x_p: [Mp, Kp] bf16, w_p: [Kp, Np] bf16, b_p: [1, Np] f32 -> [Mp, Np] f32.

    All padded dims are multiples of their tile sizes; lane dims are multiples
    of 128 so every output store is lane-dense.
    """
    M, K = x_p.shape
    _, N = w_p.shape
    grid = (M // tm, N // tn, K // tk)

    bytes_accessed = (
        x_p.size * x_p.dtype.itemsize
        + w_p.size * w_p.dtype.itemsize
        + b_p.size * b_p.dtype.itemsize
        + M * N * 4
    )

    return pl.pallas_call(
        _linear_kernel,
        out_shape=jax.ShapeDtypeStruct((M, N), jnp.float32),
        grid_spec=pltpu.PrefetchScalarGridSpec(
            num_scalar_prefetch=0,
            grid=grid,
            in_specs=[
                pl.BlockSpec((tm, tk), lambda i, j, k: (i, k),
                             memory_space=pltpu.MemorySpace.VMEM),
                pl.BlockSpec((tk, tn), lambda i, j, k: (k, j),
                             memory_space=pltpu.MemorySpace.VMEM),
                pl.BlockSpec((1, tn), lambda i, j, k: (0, j),
                             memory_space=pltpu.MemorySpace.VMEM),
            ],
            out_specs=pl.BlockSpec((tm, tn), lambda i, j, k: (i, j),
                                   memory_space=pltpu.MemorySpace.VMEM),
            scratch_shapes=[pltpu.VMEM((tm, tn), jnp.float32)],
        ),
        compiler_params=pltpu.CompilerParams(
            dimension_semantics=("parallel", "parallel", "arbitrary"),
        ),
        cost_estimate=pl.CostEstimate(
            flops=2 * M * N * K,
            transcendentals=0,
            bytes_accessed=bytes_accessed,
        ),
    )(x_p, w_p, b_p)


@functools.partial(jax.jit, static_argnames=("n_out",))
def _linear_forward(x, w_p, b_p, *, n_out):
    """Jitted forward: pad x, run the Pallas kernel, slice back to true shape."""
    M, K = x.shape
    Kp, Np = w_p.shape

    # Tile sizes (static at trace time).  Kp/Np were padded at init to be
    # multiples of min(Kp, _MAX_TILE) / min(Np, _MAX_TILE), so these divide.
    tk = min(Kp, _MAX_TILE)
    tn = min(Np, _MAX_TILE)
    tm = min(_round_up(M, _SUBLANE), 256)
    Mp = _round_up(M, tm)

    x_p = jnp.zeros((Mp, Kp), jnp.bfloat16)
    x_p = x_p.at[:M, :K].set(x.astype(jnp.bfloat16))

    out_p = _pallas_linear_padded(x_p, w_p, b_p, tm=tm, tk=tk, tn=tn)
    return out_p[:M, :n_out]


# ----------------------------------------------------------------------------
# Sub-module that the registrar stores (deterministic init, no checkpoints)
# ----------------------------------------------------------------------------
class PallasLinear:
    """Linear layer whose forward runs as a Pallas TPU kernel.

    Weights are stored pre-padded to lane-dense (multiple-of-128) shapes in
    bfloat16 (MXU native); bias and accumulation stay in float32.
    """

    def __init__(self, in_features, out_features, key):
        self.in_features = in_features
        self.out_features = out_features

        kw, kb = jax.random.split(key)
        bound = 1.0 / (in_features ** 0.5)
        w = jax.random.uniform(kw, (in_features, out_features), jnp.float32,
                               -bound, bound)
        b = jax.random.uniform(kb, (1, out_features), jnp.float32,
                               -bound, bound)

        # Unpadded f32 copies (reference / checkpointing semantics).
        self.weight = w
        self.bias = b

        # Padded, lane-dense device copies used by the kernel (padded once at
        # init, not per call).
        k_pad = _lane_pad(in_features)
        n_pad = _lane_pad(out_features)
        self._w_pad = (
            jnp.zeros((k_pad, n_pad), jnp.bfloat16)
            .at[:in_features, :out_features]
            .set(w.astype(jnp.bfloat16))
        )
        self._b_pad = (
            jnp.zeros((1, n_pad), jnp.float32).at[:, :out_features].set(b)
        )

    def __call__(self, x):
        return _linear_forward(x, self._w_pad, self._b_pad,
                               n_out=self.out_features)

    def to(self, device):
        self.weight = jax.device_put(self.weight, device)
        self.bias = jax.device_put(self.bias, device)
        self._w_pad = jax.device_put(self._w_pad, device)
        self._b_pad = jax.device_put(self._b_pad, device)
        return self

    @property
    def device(self):
        return list(self._w_pad.devices())[0]


def get_model_device(model):
    return model.device


# ----------------------------------------------------------------------------
# ModelRegistrar: faithful port of the PyTorch module's API
# ----------------------------------------------------------------------------
class ModelRegistrar:
    def __init__(self, model_dir, device):
        self.model_dict = {}
        self.model_dir = model_dir
        self.device = device

    def forward(self):
        # Exactly mirrors the PyTorch semantics: no computation here.
        raise NotImplementedError(
            "Although ModelRegistrar is a nn.Module, it is only to store parameters."
        )

    def get_model(self, name, model_if_absent=None):
        if name in self.model_dict:
            return self.model_dict[name]
        elif model_if_absent is not None:
            self.model_dict[name] = model_if_absent.to(self.device)
            return self.model_dict[name]
        else:
            raise ValueError(f"{name} was never initialized in this Registrar!")

    def get_name_match(self, name):
        return [m for k, m in self.model_dict.items() if name in k]

    def get_all_but_name_match(self, name):
        return [m for k, m in self.model_dict.items() if name not in k]

    def print_model_names(self):
        print(list(self.model_dict.keys()))

    def save_models(self, save_path):
        # TODO(synk): torch.save of an nn.ModuleDict is host-side serialization
        # with no Pallas/JAX kernel equivalent; intentionally a no-op.
        pass

    def load_models(self, model_dict):
        self.model_dict.clear()
        print("Loading Encoder")
        self.model_dict = model_dict

    def to(self, device):
        for name, model in self.model_dict.items():
            if get_model_device(model) != device:
                model.to(device)


# ----------------------------------------------------------------------------
# Demo
# ----------------------------------------------------------------------------
if __name__ == "__main__":
    key = jax.random.PRNGKey(0)
    k_model, k_x = jax.random.split(key)

    device = jax.devices()[0]
    registrar = ModelRegistrar(model_dir="/tmp/unused", device=device)

    # Register a small encoder through the registrar (Trajectron usage pattern).
    hidden_in, hidden_out, batch = 16, 32, 8
    enc = registrar.get_model(
        "PEDESTRIAN/node_history_encoder",
        model_if_absent=PallasLinear(hidden_in, hidden_out, k_model),
    )

    # Check the registrar's own forward really raises (semantic fidelity).
    try:
        registrar.forward()
        raise AssertionError("ModelRegistrar.forward() should have raised")
    except NotImplementedError:
        pass

    # Run the Pallas kernel of the stored sub-module (jitted: first call
    # compiles, second call hits the cache with no retrace).
    x = jax.random.normal(k_x, (batch, hidden_in), jnp.float32)
    out = jax.block_until_ready(enc(x))
    out = jax.block_until_ready(enc(x))

    # Correctness check: kernel uses bf16 x/W with f32 accumulation, so the
    # reference does the same rounding.
    ref = (
        x.astype(jnp.bfloat16).astype(jnp.float32)
        @ enc.weight.astype(jnp.bfloat16).astype(jnp.float32)
        + enc.bias
    )
    assert out.shape == (batch, hidden_out)
    assert jnp.allclose(out, ref, atol=1e-3, rtol=1e-3)

    print("KERNEL_OK")
</pallas_src>

<mosaic_0001>
module attributes {stable_mosaic.version = 11 : i64} {
  func.func @_linear_kernel(%arg0: i32, %arg1: i32, %arg2: i32, %arg3: memref<8x128xbf16, #tpu.memory_space<vmem>>, %arg4: memref<128x128xbf16, #tpu.memory_space<vmem>>, %arg5: memref<1x128xf32, #tpu.memory_space<vmem>>, %arg6: memref<8x128xf32, #tpu.memory_space<vmem>>, %arg7: memref<8x128xf32, #tpu.memory_space<vmem>>) attributes {dimension_semantics = [#tpu.dimension_semantics<parallel>, #tpu.dimension_semantics<parallel>, #tpu.dimension_semantics<arbitrary>], iteration_bounds = array<i64: 1, 1, 1>, scalar_prefetch = 0 : i64, scratch_operands = 1 : i64, tpu.core_type = #tpu.core_type<tc>, window_params = [{transform_indices = @transform_0, window_bounds = array<i64: 8, 128>}, {transform_indices = @transform_1, window_bounds = array<i64: 128, 128>}, {transform_indices = @transform_2, window_bounds = array<i64: 1, 128>}, {transform_indices = @transform_3, window_bounds = array<i64: 8, 128>}]} {
    %c0_i32 = arith.constant 0 : i32
    %0 = arith.cmpi eq, %arg2, %c0_i32 : i32
    %1 = arith.extui %0 : i1 to i32
    %c0_i32_0 = arith.constant 0 : i32
    %2 = arith.cmpi ne, %1, %c0_i32_0 : i32
    scf.if %2 {
      %cst_10 = arith.constant 0.000000e+00 : f32
      %12 = vector.broadcast %cst_10 : f32 to vector<8x128xf32>
      %c0_11 = arith.constant 0 : index
      %c0_12 = arith.constant 0 : index
      %13 = vector.load %arg7[%c0_11, %c0_12] : memref<8x128xf32, #tpu.memory_space<vmem>>, vector<8x128xf32>
      tpu.vector_store %arg7[%c0_11, %c0_12], %12 {strides = array<i32>} : memref<8x128xf32, #tpu.memory_space<vmem>>, vector<8x128xf32>,
    } else {
    }
    %c0 = arith.constant 0 : index
    %c0_1 = arith.constant 0 : index
    %3 = vector.load %arg7[%c0, %c0_1] : memref<8x128xf32, #tpu.memory_space<vmem>>, vector<8x128xf32>
    %c0_2 = arith.constant 0 : index
    %c0_3 = arith.constant 0 : index
    %4 = vector.load %arg3[%c0_2, %c0_3] : memref<8x128xbf16, #tpu.memory_space<vmem>>, vector<8x128xbf16>
    %c0_4 = arith.constant 0 : index
    %c0_5 = arith.constant 0 : index
    %5 = vector.load %arg4[%c0_4, %c0_5] : memref<128x128xbf16, #tpu.memory_space<vmem>>, vector<128x128xbf16>
    %cst = arith.constant dense<0.000000e+00> : vector<8x128xf32>
    %6 = tpu.matmul %4, %5, %cst {dimension_numbers = #tpu.dot_dimension_numbers<[1], [0], [0], [1], [0, 0, 1, 1], [], []>} : vector<8x128xbf16>, vector<128x128xbf16>, vector<8x128xf32> -> vector<8x128xf32>
    %7 = arith.addf %3, %6 : vector<8x128xf32>
    %c0_6 = arith.constant 0 : index
    %c0_7 = arith.constant 0 : index
    %8 = vector.load %arg7[%c0_6, %c0_7] : memref<8x128xf32, #tpu.memory_space<vmem>>, vector<8x128xf32>
    tpu.vector_store %arg7[%c0_6, %c0_7], %7 {strides = array<i32>} : memref<8x128xf32, #tpu.memory_space<vmem>>, vector<8x128xf32>,
    %c0_i32_8 = arith.constant 0 : i32
    %9 = arith.cmpi eq, %arg2, %c0_i32_8 : i32
    %10 = arith.extui %9 : i1 to i32
    %c0_i32_9 = arith.constant 0 : i32
    %11 = arith.cmpi ne, %10, %c0_i32_9 : i32
    scf.if %11 {
      %c0_10 = arith.constant 0 : index
      %c0_11 = arith.constant 0 : index
      %12 = vector.load %arg7[%c0_10, %c0_11] : memref<8x128xf32, #tpu.memory_space<vmem>>, vector<8x128xf32>
      %c0_12 = arith.constant 0 : index
      %c0_13 = arith.constant 0 : index
      %13 = vector.load %arg5[%c0_12, %c0_13] : memref<1x128xf32, #tpu.memory_space<vmem>>, vector<1x128xf32>
      %14 = vector.broadcast %13 : vector<1x128xf32> to vector<8x128xf32>
      %15 = arith.addf %12, %14 : vector<8x128xf32>
      %c0_14 = arith.constant 0 : index
      %c0_15 = arith.constant 0 : index
      %16 = vector.load %arg6[%c0_14, %c0_15] : memref<8x128xf32, #tpu.memory_space<vmem>>, vector<8x128xf32>
      tpu.vector_store %arg6[%c0_14, %c0_15], %15 {strides = array<i32>} : memref<8x128xf32, #tpu.memory_space<vmem>>, vector<8x128xf32>,
    } else {
    }
    return
  }
  func.func @transform_0(%arg0: i32, %arg1: i32, %arg2: i32) -> (i32, i32) {
    %c0_i32 = arith.constant 0 : i32
    return %arg0, %arg2 : i32, i32
  }
  func.func @transform_1(%arg0: i32, %arg1: i32, %arg2: i32) -> (i32, i32) {
    %c0_i32 = arith.constant 0 : i32
    return %arg2, %arg1 : i32, i32
  }
  func.func @transform_2(%arg0: i32, %arg1: i32, %arg2: i32) -> (i32, i32) {
    %c0_i32 = arith.constant 0 : i32
    %c0_i32_0 = arith.constant 0 : i32
    return %c0_i32, %arg1 : i32, i32
  }
  func.func @transform_3(%arg0: i32, %arg1: i32, %arg2: i32) -> (i32, i32) {
    %c0_i32 = arith.constant 0 : i32
    return %arg0, %arg1 : i32, i32
  }
}

</mosaic_0001>

<bundles_post_ra>
// kernel: _linear_forward.1
= control target key start
LH: loop header
LB: loop body
LE: loop exit
PB: predicated region body
PF: predicated region fallthrough
CT: control target
= control target key end

     0   :  { %8 = vsyncpa [#allocation4], 0  ;;  %s277_s0 = inlined_call_operand.vmem [shape: bf16[8,128], index: 0, kind: input, shape index: {}]   ;;  %s278_s1 = inlined_call_operand.hbm [shape: bf16[128,128], index: 1, kind: input, shape index: {}]   ;;  %s279_s2 = inlined_call_operand.vmem [shape: f32[1,128], index: 2, kind: input, shape index: {}]   ;;  %s280_s3 = inlined_call_operand.hbm [shape: f32[8,128], index: 3, kind: output, shape index: {}]  }
   0x1   :  { %9 = vsyncpa [#allocation5], 0  ;;  %s16_s14 = sshll.u32 %s278_s1, 4  ;;  %s241_s15 = smov [#allocation3]   ;;  %s17_s14 = int_to_ptr.hbm [resolvable:$true] %s16_s14 }
   0x2   :  { %s18_s16 = sshll.u32 %s241_s15, 4  ;;  %s242_s17 = smov 64   ;;  %s19_s16 = int_to_ptr.vmem [resolvable:$true] %s18_s16 }
   0x3   :  { %s243_s18 = smov 4  }
   0x4   :  { %24 = dma.hbm_to_vmem [thread:$0]  %s17_s14, 1024, %s19_s16, [#allocation4], %s242_s17, %s242_s17, %s243_s18  }
   0x5   :  { %237 = dma.done.wait [#allocation4], 1024  }
   0x6   :  { %238 = vsyncadd [#allocation4], 4294966272  ;;  %v183_v0 = vld [vmem:[#allocation3 + $0x38] sm:$0xff]  ;;  %v182_v1 = vld [vmem:[#allocation3 + $0x30] sm:$0xff]  ;;  %s244_s22 = smov [#allocation6]   ;;  %s134_s26 = sshll.u32 %s280_s3, 4  ;;  %s135_s26 = int_to_ptr.hbm [resolvable:$true] %s134_s26 }
   0x7   :  { %102 = vmatpush.bf16.msra.mxu0 %v183_v0  ;;  %v181_v2 = vld [vmem:[#allocation3 + $0x28] sm:$0xff]  ;;  %v180_v3 = vld [vmem:[#allocation3 + $0x20] sm:$0xff]  ;;  %v179_v4 = vld [vmem:[#allocation3 + $0x18] sm:$0xff]  ;;  %s132_s23 = sshll.u32 %s244_s22, 4  ;;  %s133_s23 = int_to_ptr.vmem [resolvable:$true] %s132_s23 }
   0x8   :  { %v178_v5 = vld [vmem:[#allocation3 + $0x10] sm:$0xff]  ;;  %v177_v6 = vld [vmem:[#allocation3 + $0x8] sm:$0xff]  ;;  %v176_v7 = vld [vmem:[#allocation3] sm:$0xff] }
   0x9   :  { %v37_v8 = vld [vmem:[%s277_s0] sm:$0xf] }
   0xa   :  { %v188_v9 = vld [vmem:[%s279_s2] ss:$0 sm:$0xff] }
   0xb   :  { %103 = vmatpush.bf16.msra.mxu0 %v182_v1 }
   0xf   :  { %104 = vmatpush.bf16.msra.mxu0 %v181_v2 }
  0x13   :  { %105 = vmatpush.bf16.msra.mxu0 %v180_v3 }
  0x17   :  { %106 = vmatpush.bf16.msra.mxu0 %v179_v4 }
  0x1b   :  { %107 = vmatpush.bf16.msra.mxu0 %v178_v5 }
  0x1f   :  { %108 = vmatpush.bf16.msra.mxu0 %v177_v6 }
  0x23   :  { %109 = vmatpush.bf16.msra.mxu0 %v176_v7 }
  0x26   :  { %110 = vmatmul.bf16.vlgmr.msra.gmra.mxu0 %v37_v8 }
  0xa3   :  { %v111_v10 = vpop.f32.mrf.mxu0 }
  0xa4   :  { %v125_v11 = vadd.f32 %v188_v9, %v111_v10 }
  0xa6   :  { %126 = vst [vmem:[#allocation6] sm:$0xff] %v125_v11 }
  0xa7   :  { %137 = dma.vmem_to_hbm [thread:$0]  %s133_s23, 128, %s135_s26, [#allocation5]  }
  0xab   :  { %v113_v12 = vpop.f32.mrf.mxu0 }
  0xac   :  { %239 = dma.done.wait [#allocation5], 128  }
  0xad   :  { %240 = vsyncadd [#allocation5], 4294967168 }
  0xae   :  { %142 = vsyncpa [#allocation4], 1 }
  0xaf   :  { %143 = vsyncpa [#allocation5], 1 }

</bundles_post_ra>
